<compile_context>
chip_gen: v6e
topology: v6e:2x2x1
jax: 0.10.0
libtpu: 0.0.40
codegen_flags: <defaults>
</compile_context>

<pallas_src>
import numpy as np
import jax
import jax.numpy as jnp
from jax.experimental import pallas as pl
from jax.experimental.pallas import tpu as pltpu


def _as_tuple(v, n):
    if isinstance(v, (list, tuple)):
        assert len(v) == n, (v, n)
        return tuple(int(x) for x in v)
    return (int(v),) * n


def _conv_out_size(n, k, s, p):
    return (n + 2 * p - k) // s + 1


def _interp_matrix(in_size, k, s, p):
    """(out_size, in_size) linear-interp matrix sampling conv-window centres."""
    out_size = _conv_out_size(in_size, k, s, p)
    centers = np.arange(out_size) * s - p + (k - 1) / 2.0
    i0 = np.floor(centers).astype(np.int64)
    w1 = centers - i0                                  # fractional part (0 or .5)
    i1 = np.clip(i0 + 1, 0, in_size - 1)               # clamp (nearest border)
    i0 = np.clip(i0, 0, in_size - 1)
    mat = np.zeros((out_size, in_size), dtype=np.float32)
    mat[np.arange(out_size), i0] += (1.0 - w1).astype(np.float32)
    mat[np.arange(out_size), i1] += w1.astype(np.float32)
    return mat


def _choose_batch_tile(B, D, W, OW, max_tb=8):
    """Largest TB < B (so grid >= 2 -> both v7x TensorCores get work) that
    divides B and makes both the input lane block (TB*D*W) and the output lane
    block (TB*D*OW) multiples of 128 (unmasked vector stores).  Falls back to
    TB == B (single full-array block, always a legal BlockSpec)."""
    for tb in range(min(B - 1, max_tb), 0, -1):
        if B % tb == 0 and (tb * D * W) % 128 == 0 and (tb * D * OW) % 128 == 0:
            return tb
    return B


def _downsample_kernel(x_ref, ah_ref, awtb_ref, o_ref):
    # x_ref   : (H, TB*D*W)        batch-group slab; lane index = (b, d, w)
    # ah_ref  : (OH, H)            H-axis interpolation matrix
    # awtb_ref: (TB*D*W, TB*D*OW)  block-diag W-axis interp matrix, with the
    #                              per-channel 1/stride flow rescale folded in
    # o_ref   : (OH, TB*D*OW)      lane-dense output slab
    y = jnp.dot(ah_ref[...], x_ref[...], preferred_element_type=jnp.float32)
    z = jnp.dot(y.astype(awtb_ref.dtype), awtb_ref[...],
                preferred_element_type=jnp.float32)
    o_ref[...] = z.astype(o_ref.dtype)                 # one unmasked store


def downsample_convlike_pallas(flow, kernel_size, stride=2, padding=0,
                               compute_dtype=jnp.bfloat16, max_batch_tile=8):
    """Downsample a flow field the way a strided conv would (NCHW, 2-D spatial)."""
    if flow.ndim != 4:
        # TODO(synk): 1-D / 3-D spatial variants not implemented (2-D flow only).
        raise NotImplementedError("only (B, D, H, W) flows are supported")
    B, D, H, W = flow.shape
    ndim = 2
    if D != ndim:
        raise ValueError(f"flow has {D} components, expected {ndim} (one per spatial dim)")

    KH, KW = _as_tuple(kernel_size, ndim)
    SH, SW = _as_tuple(stride, ndim)
    PH, PW = _as_tuple(padding, ndim)
    OH = _conv_out_size(H, KH, SH, PH)
    OW = _conv_out_size(W, KW, SW, PW)

    TB = _choose_batch_tile(B, D, W, OW, max_batch_tile)
    G = B // TB

    # Per-axis interpolation matrices (<=2 non-zeros per row).
    ah = _interp_matrix(H, KH, SH, PH)                 # (OH, H)
    aw = _interp_matrix(W, KW, SW, PW)                 # (OW, W)
    inv_scale = (1.0 / float(SH), 1.0 / float(SW))     # flow -> output-voxel units

    # Column-pass matrix: block-diagonal over (local-batch, channel) with the
    # per-channel 1/stride rescale baked into each block, so the kernel body is
    # just two matmuls with no loops / reshapes / per-channel multiplies.
    awt_d = np.zeros((D * W, D * OW), dtype=np.float32)
    for d in range(D):
        awt_d[d * W:(d + 1) * W, d * OW:(d + 1) * OW] = aw.T * inv_scale[d]
    awt_big = np.kron(np.eye(TB, dtype=np.float32), awt_d)   # (TB*D*W, TB*D*OW)

    # Wrapper-side layout (free XLA plumbing, keeps the kernel relayout-free):
    # (B, D, H, W) -> (H, B*D*W) with lane index = b*D*W + d*W + w.
    x2d = jnp.transpose(flow, (2, 0, 1, 3)).reshape(H, B * D * W)
    x2d = x2d.astype(compute_dtype)
    ah_c = jnp.asarray(ah, dtype=compute_dtype)
    awtb_c = jnp.asarray(awt_big, dtype=compute_dtype)

    out2d = pl.pallas_call(
        _downsample_kernel,
        out_shape=jax.ShapeDtypeStruct((OH, B * D * OW), flow.dtype),
        grid_spec=pltpu.PrefetchScalarGridSpec(
            num_scalar_prefetch=0,
            grid=(G,),
            in_specs=[
                pl.BlockSpec((H, TB * D * W), lambda i: (0, i)),
                pl.BlockSpec((OH, H), lambda i: (0, 0)),
                pl.BlockSpec((TB * D * W, TB * D * OW), lambda i: (0, 0)),
            ],
            out_specs=pl.BlockSpec((OH, TB * D * OW), lambda i: (0, i)),
        ),
        compiler_params=pltpu.CompilerParams(
            dimension_semantics=("parallel",),      # batch-group axis
            vmem_limit_bytes=32 * 1024 * 1024,      # explicit; tiny actual use
        ),
    )(x2d, ah_c, awtb_c)

    # Undo the lane-dense layout outside the kernel.
    out = out2d.reshape(OH, B, D, OW).transpose(1, 2, 0, 3)   # (B, D, OH, OW)
    return out


if __name__ == "__main__":
    key = jax.random.PRNGKey(0)
    # B=16 so the batch-tile chooser picks TB=8 -> grid=(2,), output lane
    # block = 8*2*8 = 128 (fully lane-dense stores), and megacore gets 2 steps.
    flow = jax.random.normal(key, (16, 2, 16, 16), dtype=jnp.float32)

    # Tolerance covers the bf16 MXU inputs (rel err ~4e-3); logic errors
    # (wrong centres / missing 1/stride) are O(1) and still caught.
    RTOL, ATOL = 1e-2, 2e-2
    scale = jnp.array([2.0, 2.0], dtype=flow.dtype).reshape(1, 2, 1, 1)

    # Config 1: odd kernel (3), stride 2, padding 1 -> integer centres 0,2,...,14.
    out1 = jax.block_until_ready(
        downsample_convlike_pallas(flow, kernel_size=3, stride=2, padding=1))
    ih = jnp.arange(8) * 2
    ref1 = jnp.take(jnp.take(flow, ih, axis=2), ih, axis=3) / scale
    assert out1.shape == ref1.shape, (out1.shape, ref1.shape)
    assert jnp.allclose(out1, ref1, rtol=RTOL, atol=ATOL), "mismatch (odd kernel)"

    # Config 2: even kernel (2), stride 2, padding 0 -> half-integer centres
    # (exercises the 0.5/0.5 linear-interpolation weights).
    out2 = jax.block_until_ready(
        downsample_convlike_pallas(flow, kernel_size=2, stride=2, padding=0))
    i0 = jnp.arange(8) * 2
    xh = 0.5 * (jnp.take(flow, i0, axis=2) + jnp.take(flow, i0 + 1, axis=2))
    ref2 = 0.5 * (jnp.take(xh, i0, axis=3) + jnp.take(xh, i0 + 1, axis=3)) / scale
    assert out2.shape == ref2.shape, (out2.shape, ref2.shape)
    assert jnp.allclose(out2, ref2, rtol=RTOL, atol=ATOL), "mismatch (even kernel)"

    print("KERNEL_OK")
</pallas_src>

<mosaic_0001>
module attributes {stable_mosaic.version = 11 : i64} {
  func.func @_downsample_kernel(%arg0: i32, %arg1: memref<16x256xbf16, #tpu.memory_space<vmem>>, %arg2: memref<8x16xbf16, #tpu.memory_space<vmem>>, %arg3: memref<256x128xbf16, #tpu.memory_space<vmem>>, %arg4: memref<8x128xf32, #tpu.memory_space<vmem>>) attributes {dimension_semantics = [#tpu.dimension_semantics<parallel>], iteration_bounds = array<i64: 2>, scalar_prefetch = 0 : i64, scratch_operands = 0 : i64, tpu.core_type = #tpu.core_type<tc>, window_params = [{transform_indices = @transform_0, window_bounds = array<i64: 16, 256>}, {pipeline_mode = #tpu.pipeline_mode<synchronous>, transform_indices = @transform_1, window_bounds = array<i64: 8, 16>}, {pipeline_mode = #tpu.pipeline_mode<synchronous>, transform_indices = @transform_2, window_bounds = array<i64: 256, 128>}, {transform_indices = @transform_3, window_bounds = array<i64: 8, 128>}]} {
    %c0 = arith.constant 0 : index
    %c0_0 = arith.constant 0 : index
    %0 = vector.load %arg2[%c0, %c0_0] : memref<8x16xbf16, #tpu.memory_space<vmem>>, vector<8x16xbf16>
    %c0_1 = arith.constant 0 : index
    %c0_2 = arith.constant 0 : index
    %1 = vector.load %arg1[%c0_1, %c0_2] : memref<16x256xbf16, #tpu.memory_space<vmem>>, vector<16x256xbf16>
    %cst = arith.constant dense<0.000000e+00> : vector<8x256xf32>
    %2 = tpu.matmul %0, %1, %cst {dimension_numbers = #tpu.dot_dimension_numbers<[1], [0], [0], [1], [0, 0, 1, 1], [], []>} : vector<8x16xbf16>, vector<16x256xbf16>, vector<8x256xf32> -> vector<8x256xf32>
    %3 = arith.truncf %2 : vector<8x256xf32> to vector<8x256xbf16>
    %c0_3 = arith.constant 0 : index
    %c0_4 = arith.constant 0 : index
    %4 = vector.load %arg3[%c0_3, %c0_4] : memref<256x128xbf16, #tpu.memory_space<vmem>>, vector<256x128xbf16>
    %cst_5 = arith.constant dense<0.000000e+00> : vector<8x128xf32>
    %5 = tpu.matmul %3, %4, %cst_5 {dimension_numbers = #tpu.dot_dimension_numbers<[1], [0], [0], [1], [0, 0, 1, 1], [], []>} : vector<8x256xbf16>, vector<256x128xbf16>, vector<8x128xf32> -> vector<8x128xf32>
    %c0_6 = arith.constant 0 : index
    %c0_7 = arith.constant 0 : index
    %6 = vector.load %arg4[%c0_6, %c0_7] : memref<8x128xf32, #tpu.memory_space<vmem>>, vector<8x128xf32>
    tpu.vector_store %arg4[%c0_6, %c0_7], %5 {strides = array<i32>} : memref<8x128xf32, #tpu.memory_space<vmem>>, vector<8x128xf32>,
    return
  }
  func.func @transform_0(%arg0: i32) -> (i32, i32) {
    %c0_i32 = arith.constant 0 : i32
    %c0_i32_0 = arith.constant 0 : i32
    return %c0_i32, %arg0 : i32, i32
  }
  func.func @transform_1(%arg0: i32) -> (i32, i32) {
    %c0_i32 = arith.constant 0 : i32
    %c0_i32_0 = arith.constant 0 : i32
    %c0_i32_1 = arith.constant 0 : i32
    return %c0_i32, %c0_i32_0 : i32, i32
  }
  func.func @transform_2(%arg0: i32) -> (i32, i32) {
    %c0_i32 = arith.constant 0 : i32
    %c0_i32_0 = arith.constant 0 : i32
    %c0_i32_1 = arith.constant 0 : i32
    return %c0_i32, %c0_i32_0 : i32, i32
  }
  func.func @transform_3(%arg0: i32) -> (i32, i32) {
    %c0_i32 = arith.constant 0 : i32
    %c0_i32_0 = arith.constant 0 : i32
    return %c0_i32, %arg0 : i32, i32
  }
}

</mosaic_0001>

<bundles_post_ra>
// kernel: tpu_custom_call.1
= control target key start
LH: loop header
LB: loop body
LE: loop exit
PB: predicated region body
PF: predicated region fallthrough
CT: control target
= control target key end

     0   :  { %8 = vsyncpa [#allocation3], 0  ;;  %s1072_s0 = inlined_call_operand.hbm [shape: bf16[16,512], index: 0, kind: input, shape index: {}]   ;;  %s1073_s1 = inlined_call_operand.hbm [shape: bf16[8,16], index: 1, kind: input, shape index: {}]   ;;  %s1074_s2 = inlined_call_operand.hbm [shape: bf16[256,128], index: 2, kind: input, shape index: {}]   ;;  %s1075_s3 = inlined_call_operand.hbm [shape: f32[8,256], index: 3, kind: output, shape index: {}]  }
   0x1   :  { %10 = vsyncpa [#allocation3 + $0x1], 0 }
   0x2   :  { %11 = vsyncpa [#allocation6], 0 }
   0x3   :  { %12 = vsyncpa [#allocation4], 0 }
   0x4   :  { %14 = vsyncpa [#allocation4 + $0x1], 0  ;;  %s881_s12 = smov 0   ;;  %s883_s13 = smov 0  }
   0x5   :  { %s885_s14 = smov 0   ;;  %s887_s15 = smov 0  }
   0x6 LB: > { %s902_s16 = sadd.s32 4294967295, %s849_s15   ;;  %s550_s17 = sadd.s32 4294967294, %s849_s15   ;;  %s849_s15 = sphi %s887_s15, %s1098_s15   ;;  %s845_s14 = sphi %s885_s14, %s1097_s14   ;;  %s841_s13 = sphi %s883_s13, %s1096_s13   ;;  %s837_s12 = sphi %s881_s12, %s1095_s12  }
   0x7   : > { %s906_s18 = sadd.s32 1, %s849_s15   ;;  %s27_s19 = sadd.s32 1, %s845_s14 }
   0x8   : > { %s24_s20 = ssub.s32 %s849_s15, %s906_s18  ;;  %p34_p0 = scmp.ne.s32.totalorder %s845_s14, %s841_s13 }
   0x9   : > { %p25_p1 = scmp.eq.s32.totalorder %s24_s20, 0  ;;  %p35_p2 = scmp.eq.s32.totalorder %s849_s15, 0 }
   0xa   : > { %p40_p3 = scmp.ne.s32.totalorder %s841_s13, %s837_s12  ;;  %p1076_p4 = scmp.eq.s32.totalorder %s902_s16, 0 }
   0xb   : > { %s918_s21 = scalar_select %p25_p1, %s845_s14, %s27_s19  }
   0xc   : > { %p920_p5 = por %p35_p2, %p34_p0  ;;  %p926_p6 = por %p1076_p4, %p40_p3 }
   0xd   : > { %p106_p7 = scmp.eq.s32.totalorder %s902_s16, 1  ;;  %p112_p8 = scmp.eq.s32.totalorder %s550_s17, 1 }
   0xe   : > { %s1081_s23 = scalar_select %p926_p6, 1, 0 }
   0xf   : > { %p551_p9 = scmp.ge.s32.totalorder %s849_s15, 1  ;;  %p119_p10 = scmp.lt.s32.totalorder %s849_s15, 3 }
  0x10   : > { %p933_p11 = por %p106_p7, %p34_p0  ;;  %p937_p12 = por %p112_p8, %p40_p3 }
  0x11   : > { %p941_p13 = pnand %p551_p9, %p119_p10  ;;  %s851_s27 = smov [#allocation5]  }
  0x12   : > { %s1082_s24 = scalar_select %p933_p11, 1, 0 }
  0x13   : > { %s1083_s25 = scalar_select %p937_p12, 1, 0 }
  0x14   : > { %s1084_s26 = scalar_select %p941_p13, 1, 0 }
  0x15   : > { %p621_p2 = pneg %p941_p13  ;;  %s132_s28 = sshll.u32 %s851_s27, 4  ;;  %s133_s28 = int_to_ptr.vmem [resolvable:$true] %s132_s28 }
  0x16   : > { %p638_p4 = scmp.lt.s32.totalorder %s849_s15, 2  ;;  %p1085_p0 = scmp.eq.s32.totalorder %s902_s16, 0 }
  0x17   : > { %s852_s4 = smov [#allocation7]   ;;  %s712_s6 = scalar_lea.vmem %s133_s28, 64 }
  0x18   : > { %p951_p7 = pnand %p621_p2, %p1085_p0  ;;  %p957_p3 = pnand %p638_p4, %p920_p5 }
  0x19   : > { %s142_s5 = sshll.u32 %s852_s4, 4  ;;  %p713_p9 = scmp.ne.s32.totalorder %s133_s28, %s712_s6  ;;  %s143_s5 = int_to_ptr.vmem [resolvable:$true] %s142_s5 }
  0x1a   : > { %p703_p8 = pneg %p951_p7  ;;  %p720_p0 = scmp.lt.s32.totalorder %s133_s28, %s133_s28 }
  0x1b   : > { %p721_p1 = scmp.lt.s32.totalorder %s712_s6, %s712_s6 }
  0x1c   : > { %p715_p10 = pnand %p713_p9, %p703_p8 }
  0x1d   : > { %p722_p12 = por %p721_p1, %p720_p0 }
  0x1e   : > { %p716_p2 = pneg %p715_p10 }
  0x20   : > { %p723_p11 = pnand %p722_p12, %p716_p2 }
  0x22   : > { %726 = shalt.err (!%p723_p11)
}
  0x23   : > { %624 = dma.hbm_to_vmem [thread:$0]  (!%p951_p7), %s1073_s1, 64, %s133_s28, [#allocation6]  }
  0x24   : > { %s156_s9 = sand.u32 1, %s845_s14   ;;  %s738_s10 = scalar_lea.vmem %s143_s5, 2048 }
  0x25   : > { %p739_p4 = scmp.ne.s32.totalorder %s143_s5, %s738_s10  ;;  %p746_p10 = scmp.lt.s32.totalorder %s143_s5, %s143_s5 }
  0x26   : > { %p747_p6 = scmp.lt.s32.totalorder %s738_s10, %s738_s10 }
  0x27   : > { %p741_p5 = pnand %p739_p4, %p703_p8 }
  0x28   : > { %p748_p1 = por %p747_p6, %p746_p10 }
  0x29   : > { %p742_p9 = pneg %p741_p5 }
  0x2b   : > { %p749_p12 = pnand %p748_p1, %p742_p9 }
  0x2d   : > { %752 = shalt.err (!%p749_p12)
}
  0x2e   : > { %s853_s11 = smov 64   ;;  %s854_s17 = smov 4  }
  0x2f   : > { %627 = dma.hbm_to_vmem [thread:$0]  (!%p951_p7), %s1074_s2, 2048, %s143_s5, [#allocation6], %s853_s11, %s853_s11, %s854_s17  }
  0x30   : > { %s555_s22 = sshll.u32 %s156_s9, 4  ;;  %s586_s27 = sshll.u32 %s849_s15, 7 }
  0x31   : > { %s984_s6 = scalar_lea.hbm %s1072_s0, %s586_s27  ;;  %s160_s7 = scalar_lea.vmem [#allocation2], %s555_s22 }
  0x32   : > { %s167_s8 = sshll.u32 %s160_s7, 4  ;;  %s988_s10 = scalar_lea.sflag [#allocation3], %s156_s9  ;;  %s986_s8 = int_to_ptr.vmem [resolvable:$true] %s167_s8 }
  0x33   : > { %s753_s29 = scalar_lea.hbm %s984_s6, 256  ;;  %p755_p11 = pneg %p957_p3 }
  0x34   : > { %p754_p6 = scmp.ne.s32.totalorder %s984_s6, %s753_s29  ;;  %s758_s17 = scalar_lea.hbm %s1072_s0, 512 }
  0x35   : > { %p759_p2 = scmp.lt.s32.totalorder %s984_s6, %s1072_s0  ;;  %p760_p0 = scmp.lt.s32.totalorder %s758_s17, %s753_s29 }
  0x36   : > { %p756_p7 = pnand %p755_p11, %p754_p6 }
  0x37   : > { %p761_p4 = por %p760_p0, %p759_p2 }
  0x38   : > { %p757_p8 = pneg %p756_p7 }
  0x3a   : > { %p762_p5 = pnand %p761_p4, %p757_p8 }
  0x3c   : > { %765 = shalt.err (!%p762_p5)
}
  0x3d   : > { %s766_s9 = scalar_lea.vmem %s986_s8, 256  ;;  %s855_s22 = smov [#allocation2]  }
  0x3e   : > { %p767_p9 = scmp.ne.s32.totalorder %s986_s8, %s766_s9  ;;  %s771_s27 = sshll.u32 %s855_s22, 4  ;;  %s772_s27 = int_to_ptr.vmem [resolvable:$false] %s771_s27 }
  0x3f   : > { %s773_s28 = scalar_lea.vmem %s772_s27, 512  ;;  %p774_p12 = scmp.lt.s32.totalorder %s986_s8, %s772_s27 }
  0x40   : > { %p769_p10 = pnand %p767_p9, %p755_p11  ;;  %p775_p6 = scmp.lt.s32.totalorder %s773_s28, %s766_s9 }
  0x42   : > { %p770_p1 = pneg %p769_p10  ;;  %p776_p7 = por %p775_p6, %p774_p12 }
  0x44   : > { %p777_p13 = pnand %p776_p7, %p770_p1 }
  0x46   : > { %780 = shalt.err (!%p777_p13)
}
  0x47   : > { %s856_s4 = smov 256   ;;  %s857_s7 = smov 128  }
  0x48   : > { %s858_s29 = smov 8   ;;  %p1088_p11 = scmp.ne.s32.totalorder %s1084_s26, 0 }
  0x49   : > { %631 = dma.hbm_to_vmem [thread:$0]  (!%p957_p3), %s984_s6, 256, %s986_s8, %s988_s10, %s856_s4, %s857_s7, %s858_s29  }
  0x4a   : > { %179 = sbr.rel (%p1088_p11) target bundleno = 497 (0x1f1), region = 32  ;;  %s1012_s5 = sand.u32 (!%p1088_p11), 1, %s841_s13  }
  0x4b   : > { %s559_s11 = sshll.u32 (!%p1088_p11), %s1012_s5, 4  ;;  %s182_s17 = scalar_lea.sflag (!%p1088_p11), [#allocation3], %s1012_s5 }
  0x4c   : > { %s185_s19 = scalar_lea.vmem (!%p1088_p11), [#allocation2], %s559_s11  ;;  %p1089_p13 = scmp.ne.s32.totalorder (!%p1088_p11), %s1081_s23, 0 }
  0x4f   : > { %824 = dma.done.wait (%p1089_p13), %s182_s17, 256  }
  0x50   : > { %826 = vsyncadd (%p1089_p13), %s182_s17, 4294967040  ;;  %p1090_p8 = scmp.eq.s32.totalorder %s902_s16, 0 }
  0x52   : > { %828 = dma.done.wait (%p1090_p8), [#allocation6], 2112   ;;  %p1091_p3 = pmov %p1090_p8 }
  0x53   : > { %v859_v0 = vmov 0   ;;  %v682_v1 = vld [vmem:[%s185_s19 + $0x4] ss:$8 sps:$4 sm:$0xff]   ;;  %v684_v2 = vld [vmem:[%s185_s19] ss:$8 sps:$4 sm:$0xff]   ;;  %vm231_vm0 = vcmask 130048  }
  0x54   : > { %830 = vsyncadd (%p1091_p3), [#allocation6], 4294965184  ;;  %267 = vmatprep.mubr.bf16.mxu0 %v859_v0  ;;  %v218_v3 = vld [vmem:[#allocation5] sm:$0xf]  ;;  %249 = vmatprep.subr.bf16.mxu0 %v682_v1  ;;  %v687_v6 = vld [vmem:[#allocation7 + $0x70] sm:$0xff]   ;;  %s562_s23 = sshll.u32 %s1012_s5, 3 }
  0x55   : > { %v685_v4 = vld [vmem:[#allocation7 + $0x78] sm:$0xff]   ;;  %250 = vmatpush1.bf16.msra.mxu0 %v684_v2  ;;  %v688_v7 = vld [vmem:[#allocation7 + $0x30] sm:$0xff]   ;;  %v689_v8 = vld [vmem:[#allocation7 + $0x68] sm:$0xff]   ;;  %s583_s26 = sshll.u32 %s902_s16, 7  ;;  %s215_s30 = scalar_lea.vmem [#allocation8], %s562_s23 }
  0x56   : > { %v686_v5 = vld [vmem:[#allocation7 + $0x38] sm:$0xff]   ;;  %587 = vmatprep.subr.bf16.mxu1 %v685_v4  ;;  %v690_v9 = vld [vmem:[#allocation7 + $0x28] sm:$0xff]   ;;  %v691_v10 = vld [vmem:[#allocation7 + $0x60] sm:$0xff]   ;;  %s461_s6 = sshll.u32 %s215_s30, 4  ;;  %s1029_s20 = scalar_lea.hbm %s1075_s3, %s583_s26  ;;  %s1031_s6 = int_to_ptr.vmem [resolvable:$true] %s461_s6 }
  0x57   : > { %588 = vmatpush3.bf16.msra.mxu1 %v686_v5  ;;  %v692_v11 = vld [vmem:[#allocation7 + $0x20] sm:$0xff]   ;;  %v693_v12 = vld [vmem:[#allocation7 + $0x58] sm:$0xff]   ;;  %v695_v14 = vld [vmem:[#allocation7 + $0x50] sm:$0xff]   ;;  %s448_s9 = scalar_lea.sflag [#allocation4], %s1012_s5  ;;  %s781_s22 = scalar_lea.vmem %s1031_s6, 128 }
  0x58   : > { %565 = vmatmul.mubr.msk.bf16.vlgmr.msra.gmra.mxu0 %vm231_vm0, %v218_v3  ;;  %589 = vmatprep.subr.bf16.mxu1 %v687_v6  ;;  %v694_v13 = vld [vmem:[#allocation7 + $0x18] sm:$0xff]   ;;  %v696_v15 = vld [vmem:[#allocation7 + $0x10] sm:$0xff]   ;;  %v697_v16 = vld [vmem:[#allocation7 + $0x48] sm:$0xff]   ;;  %p782_p2 = scmp.ne.s32.totalorder %s1031_s6, %s781_s22  ;;  %p1092_p0 = scmp.ne.s32.totalorder %s1082_s24, 0 }
  0x59   : > { %v698_v17 = vld [vmem:[#allocation7 + $0x8] sm:$0xff]   ;;  %v699_v18 = vld [vmem:[#allocation7 + $0x40] sm:$0xff]   ;;  %s860_s16 = smov [#allocation8]  }
  0x5a   : > { %v700_v19 = vld [vmem:[#allocation7] sm:$0xff]   ;;  %p783_p4 = pnand %p782_p2, %p1092_p0  ;;  %s785_s27 = sshll.u32 %s860_s16, 4  ;;  %s786_s27 = int_to_ptr.vmem [resolvable:$false] %s785_s27 }
  0x5b   : > { %590 = vmatpush3.bf16.msra.mxu1 %v688_v7  ;;  %s787_s28 = scalar_lea.vmem %s786_s27, 256  ;;  %p788_p9 = scmp.lt.s32.totalorder %s1031_s6, %s786_s27 }
  0x5c   : > { %591 = vmatprep.subr.bf16.mxu1 %v689_v8  ;;  %p784_p5 = pneg %p783_p4  ;;  %p789_p10 = scmp.lt.s32.totalorder %s787_s28, %s781_s22 }
  0x5e   : > { %p790_p1 = por %p789_p10, %p788_p9 }
  0x5f   : > { %592 = vmatpush3.bf16.msra.mxu1 %v690_v9 }
  0x60   : > { %593 = vmatprep.subr.bf16.mxu1 %v691_v10  ;;  %p791_p12 = pnand %p790_p1, %p784_p5 }
  0x63   : > { %594 = vmatpush3.bf16.msra.mxu1 %v692_v11 }
  0x64   : > { %595 = vmatprep.subr.bf16.mxu1 %v693_v12 }
  0x67   : > { %596 = vmatpush3.bf16.msra.mxu1 %v694_v13 }
  0x68   : > { %597 = vmatprep.subr.bf16.mxu1 %v695_v14 }
  0x6b   : > { %598 = vmatpush3.bf16.msra.mxu1 %v696_v15 }
  0x6c   : > { %599 = vmatprep.subr.bf16.mxu1 %v697_v16 }
  0x6f   : > { %600 = vmatpush3.bf16.msra.mxu1 %v698_v17 }
  0x70   : > { %601 = vmatprep.subr.bf16.mxu1 %v699_v18 }
  0x73   : > { %602 = vmatpush3.bf16.msra.mxu1 %v700_v19 }
 0x118   : > { %v269_v20 = vpop.f32.mrf.mxu0 }
 0x119   : > { %v276_v23 = vpack.c.bf16 %v269_v20, %v269_v20 }
 0x11a   : > { %v271_v21 = vpop.f32.mrf.mxu0 }
 0x11b   : > { %v277_v22 = vpack.c.bf16 %v271_v21, %v271_v21 }
 0x11c   : > { %v273_v24 = vpop.f32.mrf.mxu0 }
 0x11d   : > { %438 = vmatprep.mubr.bf16.mxu1 %v277_v22 }
 0x11e   : > { %v274_v25 = vpop.f32.mrf.mxu0  ;;  %439 = vmatmul.mubr.bf16.vlgmr.msra.gmra.mxu1 %v276_v23 }
 0x1de   : > { %v603_v26 = vpop.f32.mrf.mxu1 }
 0x1e0   : > { %v604_v27 = vpop.f32.mrf.mxu1 }
 0x1e1   : > { %v605_v28 = vadd.f32 %v604_v27, %v603_v26 }
 0x1e2   : > { %v606_v29 = vpop.f32.mrf.mxu1 }
 0x1e3   : > { %446 = vst [vmem:[%s215_s30] sm:$0xff] %v605_v28 }
 0x1e4   : > { %v607_v30 = vpop.f32.mrf.mxu1 }
 0x1e5   : > { %794 = shalt.err (!%p791_p12)
}
 0x1e6   : > { %s795_s4 = scalar_lea.hbm %s1029_s20, 128  ;;  %s799_s5 = scalar_lea.hbm %s1075_s3, 256 }
 0x1e7   : > { %p796_p6 = scmp.ne.s32.totalorder %s1029_s20, %s795_s4  ;;  %p800_p13 = scmp.lt.s32.totalorder %s1029_s20, %s1075_s3 }
 0x1e8   : > { %p801_p8 = scmp.lt.s32.totalorder %s799_s5, %s795_s4 }
 0x1e9   : > { %p797_p7 = pnand %p796_p6, %p1092_p0 }
 0x1ea   : > { %p802_p3 = por %p801_p8, %p800_p13 }
 0x1eb   : > { %p798_p11 = pneg %p797_p7 }
 0x1ed   : > { %p803_p2 = pnand %p802_p3, %p798_p11 }
 0x1ef   : > { %806 = shalt.err (!%p803_p2)
}
 0x1f0   : > { %619 = dma.vmem_to_hbm [thread:$0]  (%p1092_p0), %s1031_s6, 128, %s1029_s20, %s448_s9  }
 0x1f1 PF: > { %s473_s19 = sand.u32 1, %s837_s12   ;;  %p1093_p4 = scmp.ne.s32.totalorder %s1083_s25, 0 }
 0x1f2   : > { %p1094_p5 = scmp.ge.s32.totalorder %s849_s15, 2  ;;  %s474_s23 = scalar_lea.sflag [#allocation4], %s473_s19 }
 0x1f4   : > { %p633_p9 = pnand %p1094_p5, %p1093_p4 }
 0x1f6   : > { %p634_p10 = pneg %p633_p9 }
 0x1f8   : > { %832 = dma.done.wait (%p634_p10), %s474_s23, 128  }
 0x1f9   : > { %834 = vsyncadd (%p634_p10), %s474_s23, 4294967168  ;;  %p17_p1 = scmp.ge.s32.totalorder %s906_s18, 4   ;;  %s1095_s12 = smov %s841_s13 }
 0x1fa   : > { %s1096_s13 = smov %s845_s14  ;;  %s1097_s14 = smov %s918_s21 }
 0x1fb   : > { %s1098_s15 = smov %s906_s18  ;;  %19 = sbr.rel (!%p17_p1) target bundleno = 6 (0x6), region = 85 }
 0x200   :  { %479 = vsyncpa [#allocation3], 1 }
 0x201   :  { %481 = vsyncpa [#allocation3 + $0x1], 1 }
 0x202   :  { %482 = vsyncpa [#allocation6], 1 }
 0x203   :  { %483 = vsyncpa [#allocation4], 1 }
 0x204   :  { %485 = vsyncpa [#allocation4 + $0x1], 1 }

</bundles_post_ra>
